<compile_context>
chip_gen: v6e
topology: v6e:2x2x1
jax: 0.10.0
libtpu: 0.0.40
codegen_flags: <defaults>
</compile_context>

<pallas_src>
import math
import functools

import jax
import jax.numpy as jnp
from jax import lax
from jax.experimental import pallas as pl
from jax.experimental.pallas import tpu as pltpu


# ----------------------------------------------------------------------------
# helpers
# ----------------------------------------------------------------------------
def _compiler_params(semantics, vmem_need_bytes):
    # Explicit, bounded VMEM budget: generous for double-buffering, but kept
    # under v7x's 64 MiB physical VMEM.
    limit = int(min(max(2 * vmem_need_bytes, 32 * 1024 * 1024), 64 * 1024 * 1024))
    return pltpu.CompilerParams(dimension_semantics=semantics,
                                vmem_limit_bytes=limit)


# ----------------------------------------------------------------------------
# Tiled linear kernel: y = x @ w + b
# ----------------------------------------------------------------------------
def _linear_kernel(x_ref, w_ref, b_ref, o_ref):
    # x: (TN, d_in), w: (d_in, TD), b: (1, TD) f32, o: (TN, TD)
    acc = jnp.dot(x_ref[...], w_ref[...], preferred_element_type=jnp.float32)
    o_ref[...] = (acc + b_ref[...].astype(jnp.float32)).astype(o_ref.dtype)


def linear_pallas(x2d, w, b, *, row_tile=256, col_tile=1024):
    """x2d: (N, d_in); w: (d_in, d_out); b: (d_out,) f32 -> (N, d_out)."""
    N, d_in = x2d.shape
    d_out = w.shape[1]

    tn = N if N <= row_tile else row_tile
    td = d_out if d_out <= col_tile else col_tile
    # Rows innermost: weight/bias block indices are row-invariant, so they
    # stay resident (no re-DMA per row tile); x/out tiles stream/pipeline.
    grid = (pl.cdiv(d_out, td), pl.cdiv(N, tn))

    nbytes = jnp.dtype(x2d.dtype).itemsize
    vmem_need = (2 * tn * d_in * nbytes      # double-buffered x tiles
                 + 2 * d_in * td * nbytes    # weight tile (budget 2 buffers)
                 + 2 * td * 4                # bias
                 + 2 * tn * td * nbytes)     # double-buffered out tiles
    # TODO(synk): add K (d_in) tiling + accumulator scratch for very large
    #             d_model where a (d_in, td) weight tile no longer fits VMEM.

    return pl.pallas_call(
        _linear_kernel,
        out_shape=jax.ShapeDtypeStruct((N, d_out), x2d.dtype),
        grid=grid,
        in_specs=[
            pl.BlockSpec((tn, d_in), lambda j, i: (i, 0)),
            pl.BlockSpec((d_in, td), lambda j, i: (0, j)),
            pl.BlockSpec((1, td), lambda j, i: (0, j)),
        ],
        out_specs=pl.BlockSpec((tn, td), lambda j, i: (i, j)),
        compiler_params=_compiler_params(("parallel", "parallel"), vmem_need),
    )(x2d, w, b.reshape(1, d_out))


# ----------------------------------------------------------------------------
# Attention kernel: operates directly on (B, S, D) head-concat layout
# ----------------------------------------------------------------------------
def _mha_kernel(q_ref, k_ref, v_ref, o_ref, *, heads, d_k, scale):
    # q: (TQ, D), k/v: (S, D), o: (TQ, D) with D = heads * d_k.
    # Heads live in contiguous d_k-wide column groups (same layout as the
    # PyTorch module's concat); loop heads with static ref slices and emit one
    # lane-dense (TQ, D) store at the end (no per-head partial stores).
    outs = []
    for h in range(heads):
        lo = h * d_k
        qh = q_ref[:, lo:lo + d_k]
        kh = k_ref[:, lo:lo + d_k]
        vh = v_ref[:, lo:lo + d_k]
        # (TQ, d_k) x (S, d_k) contracted on d_k -> (TQ, S); no explicit k.T.
        s = lax.dot_general(qh, kh, (((1,), (1,)), ((), ())),
                            preferred_element_type=jnp.float32) * scale
        s = s - jnp.max(s, axis=-1, keepdims=True)          # f32 softmax stats
        p = jnp.exp(s)
        p = p * pl.reciprocal(jnp.sum(p, axis=-1, keepdims=True), approx=True)
        outs.append(
            lax.dot_general(p.astype(vh.dtype), vh, (((1,), (0,)), ((), ())),
                            preferred_element_type=jnp.float32))
    o_ref[...] = jnp.concatenate(outs, axis=-1).astype(o_ref.dtype)


def mha_attention(q2, k2, v2, heads, *, q_tile=256):
    """q2,k2,v2: (B, S, D) head-concat layout -> (B, S, D) same layout."""
    B, S, D = q2.shape
    d_k = D // heads
    scale = 1.0 / math.sqrt(d_k)
    tq = S if S <= q_tile else q_tile
    grid = (B, pl.cdiv(S, tq))

    nbytes = jnp.dtype(q2.dtype).itemsize
    vmem_need = (2 * tq * D * nbytes          # q tiles
                 + 2 * 2 * S * D * nbytes     # k, v blocks
                 + 2 * tq * D * nbytes        # out tiles
                 + 2 * tq * S * 4)            # f32 scores / probs

    kern = functools.partial(_mha_kernel, heads=heads, d_k=d_k, scale=scale)
    return pl.pallas_call(
        kern,
        out_shape=jax.ShapeDtypeStruct((B, S, D), q2.dtype),
        grid=grid,
        in_specs=[
            pl.BlockSpec((None, tq, D), lambda b, qi: (b, qi, 0)),
            pl.BlockSpec((None, S, D), lambda b, qi: (b, 0, 0)),
            pl.BlockSpec((None, S, D), lambda b, qi: (b, 0, 0)),
        ],
        out_specs=pl.BlockSpec((None, tq, D), lambda b, qi: (b, qi, 0)),
        compiler_params=_compiler_params(("parallel", "parallel"), vmem_need),
    )(q2, k2, v2)


# ----------------------------------------------------------------------------
# MultiHeadAttention forward
# ----------------------------------------------------------------------------
class MultiHeadAttentionPallas:
    def __init__(self, heads, d_model, key, compute_dtype=jnp.float32):
        assert d_model % heads == 0
        self.h = heads
        self.d_model = d_model
        self.d_k = d_model // heads
        self.compute_dtype = compute_dtype

        # Deterministic init mimicking nn.Linear default (uniform +-1/sqrt(fan_in)).
        bound = 1.0 / math.sqrt(d_model)
        ks = jax.random.split(key, 8)

        def u(k, shape):
            return jax.random.uniform(k, shape, jnp.float32, -bound, bound)

        # Torch nn.Linear weights are (out, in); store transposed (in, out).
        self.wq = u(ks[0], (d_model, d_model)); self.bq = u(ks[1], (d_model,))
        self.wk = u(ks[2], (d_model, d_model)); self.bk = u(ks[3], (d_model,))
        self.wv = u(ks[4], (d_model, d_model)); self.bv = u(ks[5], (d_model,))
        self.wo = u(ks[6], (d_model, d_model)); self.bo = u(ks[7], (d_model,))

        # MXU operands stored in compute_dtype (bf16 doubles MXU throughput,
        # halves weight DMA); biases + softmax stats stay f32.
        cd = compute_dtype
        self._wq = self.wq.astype(cd)
        self._wk = self.wk.astype(cd)
        self._wv = self.wv.astype(cd)
        self._wo = self.wo.astype(cd)
        # Fused QKV weight for the self-attention path: single projection call,
        # activation read from HBM once instead of three times.
        self._wqkv = jnp.concatenate([self._wq, self._wk, self._wv], axis=1)
        self._bqkv = jnp.concatenate([self.bq, self.bk, self.bv], axis=0)

    def __call__(self, q, k, v, mask=None):
        # TODO(synk): mask / attention-prob dropout not implemented (eval mode).
        assert mask is None, "mask path not implemented"
        B, S, D = q.shape
        cd = self.compute_dtype
        in_dtype = q.dtype

        if (q is k) and (k is v):
            # Self-attention fast path: one fused QKV projection call.
            qkv = linear_pallas(q.reshape(B * S, D).astype(cd),
                                self._wqkv, self._bqkv)        # (B*S, 3*D)
            q2 = qkv[:, 0 * D:1 * D]
            k2 = qkv[:, 1 * D:2 * D]
            v2 = qkv[:, 2 * D:3 * D]
        else:
            q2 = linear_pallas(q.reshape(B * S, D).astype(cd), self._wq, self.bq)
            k2 = linear_pallas(k.reshape(B * S, D).astype(cd), self._wk, self.bk)
            v2 = linear_pallas(v.reshape(B * S, D).astype(cd), self._wv, self.bv)

        # Heads stay in their natural d_k-wide column groups of the (B, S, D)
        # projection output: no head split/concat transposes through HBM; the
        # attention kernel writes the "concat" layout directly.
        attn = mha_attention(q2.reshape(B, S, D), k2.reshape(B, S, D),
                             v2.reshape(B, S, D), self.h)       # (B, S, D)

        out = linear_pallas(attn.reshape(B * S, D), self._wo, self.bo)
        return out.reshape(B, S, D).astype(in_dtype)


# ----------------------------------------------------------------------------
# Pure-JAX reference (matches the PyTorch module semantics, f32)
# ----------------------------------------------------------------------------
def reference_forward(mha, q, k, v):
    B, S, D = q.shape
    H, Dk = mha.h, mha.d_k

    def lin(x, w, b):
        return x @ w + b

    def split(x):
        return x.reshape(B, S, H, Dk).transpose(0, 2, 1, 3)

    q2 = split(lin(q.reshape(B * S, D), mha.wq, mha.bq))
    k2 = split(lin(k.reshape(B * S, D), mha.wk, mha.bk))
    v2 = split(lin(v.reshape(B * S, D), mha.wv, mha.bv))
    scores = jnp.einsum("bhqd,bhkd->bhqk", q2, k2) / math.sqrt(Dk)
    p = jax.nn.softmax(scores, axis=-1)
    o = jnp.einsum("bhqk,bhkd->bhqd", p, v2)
    concat = o.transpose(0, 2, 1, 3).reshape(B * S, D)
    return lin(concat, mha.wo, mha.bo).reshape(B, S, D)


if __name__ == "__main__":
    key = jax.random.PRNGKey(0)
    kq, kk, kv, kp = jax.random.split(key, 4)

    batch, seq, heads, d_model = 2, 8, 4, 32  # d_k = 8

    q = jax.random.normal(kq, (batch, seq, d_model), jnp.float32)
    k = jax.random.normal(kk, (batch, seq, d_model), jnp.float32)
    v = jax.random.normal(kv, (batch, seq, d_model), jnp.float32)

    # f32 MXU operands: tight check (only approx softmax reciprocal differs).
    mha = MultiHeadAttentionPallas(heads, d_model, kp, compute_dtype=jnp.float32)

    out_cross = jax.block_until_ready(mha(q, k, v))          # cross-attn path
    ref_cross = reference_forward(mha, q, k, v)
    assert out_cross.shape == (batch, seq, d_model)
    assert jnp.allclose(out_cross, ref_cross, atol=5e-3, rtol=5e-3), "cross mismatch"

    out_self = jax.block_until_ready(mha(q, q, q))           # fused-QKV path
    ref_self = reference_forward(mha, q, q, q)
    assert jnp.allclose(out_self, ref_self, atol=5e-3, rtol=5e-3), "self mismatch"

    # bf16 MXU operands (f32 accumulation + f32 softmax stats): sanity check.
    mha_bf16 = MultiHeadAttentionPallas(heads, d_model, kp,
                                        compute_dtype=jnp.bfloat16)
    out_bf16 = jax.block_until_ready(mha_bf16(q, q, q))
    assert jnp.allclose(out_bf16, ref_self, atol=1e-1, rtol=1e-1), "bf16 mismatch"

    print("KERNEL_OK")
</pallas_src>

<mosaic_0001>
module attributes {stable_mosaic.version = 11 : i64} {
  func.func @_linear_kernel(%arg0: i32, %arg1: i32, %arg2: memref<16x32xf32, #tpu.memory_space<vmem>>, %arg3: memref<32x32xf32, #tpu.memory_space<vmem>>, %arg4: memref<1x32xf32, #tpu.memory_space<vmem>>, %arg5: memref<16x32xf32, #tpu.memory_space<vmem>>) attributes {dimension_semantics = [#tpu.dimension_semantics<parallel>, #tpu.dimension_semantics<parallel>], iteration_bounds = array<i64: 1, 1>, scalar_prefetch = 0 : i64, scratch_operands = 0 : i64, tpu.core_type = #tpu.core_type<tc>, window_params = [{transform_indices = @transform_0, window_bounds = array<i64: 16, 32>}, {transform_indices = @transform_1, window_bounds = array<i64: 32, 32>}, {transform_indices = @transform_2, window_bounds = array<i64: 1, 32>}, {transform_indices = @transform_3, window_bounds = array<i64: 16, 32>}]} {
    %c0 = arith.constant 0 : index
    %c0_0 = arith.constant 0 : index
    %0 = vector.load %arg2[%c0, %c0_0] : memref<16x32xf32, #tpu.memory_space<vmem>>, vector<16x32xf32>
    %c0_1 = arith.constant 0 : index
    %c0_2 = arith.constant 0 : index
    %1 = vector.load %arg3[%c0_1, %c0_2] : memref<32x32xf32, #tpu.memory_space<vmem>>, vector<32x32xf32>
    %cst = arith.constant dense<0.000000e+00> : vector<16x32xf32>
    %2 = tpu.matmul %0, %1, %cst {dimension_numbers = #tpu.dot_dimension_numbers<[1], [0], [0], [1], [0, 0, 1, 1], [], []>} : vector<16x32xf32>, vector<32x32xf32>, vector<16x32xf32> -> vector<16x32xf32>
    %c0_3 = arith.constant 0 : index
    %c0_4 = arith.constant 0 : index
    %3 = vector.load %arg4[%c0_3, %c0_4] : memref<1x32xf32, #tpu.memory_space<vmem>>, vector<1x32xf32>
    %4 = vector.broadcast %3 : vector<1x32xf32> to vector<16x32xf32>
    %5 = arith.addf %2, %4 : vector<16x32xf32>
    %c0_5 = arith.constant 0 : index
    %c0_6 = arith.constant 0 : index
    %6 = vector.load %arg5[%c0_5, %c0_6] : memref<16x32xf32, #tpu.memory_space<vmem>>, vector<16x32xf32>
    tpu.vector_store %arg5[%c0_5, %c0_6], %5 {strides = array<i32>} : memref<16x32xf32, #tpu.memory_space<vmem>>, vector<16x32xf32>,
    return
  }
  func.func @transform_0(%arg0: i32, %arg1: i32) -> (i32, i32) {
    %c0_i32 = arith.constant 0 : i32
    %c0_i32_0 = arith.constant 0 : i32
    return %arg1, %c0_i32 : i32, i32
  }
  func.func @transform_1(%arg0: i32, %arg1: i32) -> (i32, i32) {
    %c0_i32 = arith.constant 0 : i32
    %c0_i32_0 = arith.constant 0 : i32
    return %c0_i32, %arg0 : i32, i32
  }
  func.func @transform_2(%arg0: i32, %arg1: i32) -> (i32, i32) {
    %c0_i32 = arith.constant 0 : i32
    %c0_i32_0 = arith.constant 0 : i32
    return %c0_i32, %arg0 : i32, i32
  }
  func.func @transform_3(%arg0: i32, %arg1: i32) -> (i32, i32) {
    %c0_i32 = arith.constant 0 : i32
    return %arg1, %arg0 : i32, i32
  }
}

</mosaic_0001>

<bundles_post_ra>
// kernel: tpu_custom_call.1
= control target key start
LH: loop header
LB: loop body
LE: loop exit
PB: predicated region body
PF: predicated region fallthrough
CT: control target
= control target key end

     0   :  { %8 = vsyncpa [#allocation3], 0  ;;  %s299_s0 = inlined_call_operand.hbm [shape: f32[16,32], index: 0, kind: input, shape index: {}]   ;;  %s300_s1 = inlined_call_operand.hbm [shape: f32[32,32], index: 1, kind: input, shape index: {}]   ;;  %s301_s2 = inlined_call_operand.vmem [shape: f32[1,32], index: 2, kind: input, shape index: {}]   ;;  %s302_s3 = inlined_call_operand.hbm [shape: f32[16,32], index: 3, kind: output, shape index: {}]  }
   0x1   :  { %9 = vsyncpa [#allocation6], 0 }
   0x2   :  { %10 = vsyncpa [#allocation4], 0  ;;  %s249_s12 = smov [#allocation2]  }
   0x3   :  { %s16_s13 = sshll.u32 %s249_s12, 4  ;;  %s17_s13 = int_to_ptr.vmem [resolvable:$true] %s16_s13 }
   0x4   :  { %s191_s14 = scalar_lea.vmem %s17_s13, 256  ;;  %p196_p1 = scmp.lt.s32.totalorder %s17_s13, %s17_s13 }
   0x5   :  { %p192_p0 = scmp.ne.s32.totalorder %s17_s13, %s191_s14  ;;  %p197_p2 = scmp.lt.s32.totalorder %s191_s14, %s191_s14 }
   0x7   :  { %p198_p3 = por %p197_p2, %p196_p1 }
   0x9   :  { %p199_p4 = pnand %p198_p3, %p192_p0 }
   0xb   :  { %202 = shalt.err (!%p199_p4)
}
   0xc   :  { %s250_s15 = smov 128   ;;  %s251_s16 = smov 8  }
   0xd   :  { %22 = dma.hbm_to_vmem [thread:$0]  %s299_s0, 256, %s17_s13, [#allocation3], %s250_s15, %s250_s15, %s251_s16  }
   0xe   :  { %s252_s19 = smov [#allocation5]  }
   0xf   :  { %s28_s20 = sshll.u32 %s252_s19, 4  ;;  %s29_s20 = int_to_ptr.vmem [resolvable:$true] %s28_s20 }
  0x10   :  { %s211_s21 = scalar_lea.vmem %s29_s20, 512  ;;  %p216_p6 = scmp.lt.s32.totalorder %s29_s20, %s29_s20 }
  0x11   :  { %p212_p5 = scmp.ne.s32.totalorder %s29_s20, %s211_s21  ;;  %p217_p7 = scmp.lt.s32.totalorder %s211_s21, %s211_s21 }
  0x13   :  { %p218_p8 = por %p217_p7, %p216_p6 }
  0x15   :  { %p219_p9 = pnand %p218_p8, %p212_p5 }
  0x17   :  { %222 = shalt.err (!%p219_p9)
}
  0x18   :  { %34 = dma.hbm_to_vmem [thread:$0]  %s300_s1, 512, %s29_s20, [#allocation6], %s250_s15, %s250_s15, %s251_s16  }
  0x19   :  { %243 = dma.done.wait [#allocation3], 256  }
  0x1a   :  { %244 = vsyncadd [#allocation3], 4294967040 }
  0x1b   :  { %245 = dma.done.wait [#allocation6], 512  }
  0x1c   :  { %246 = vsyncadd [#allocation6], 4294966784  ;;  %vm56_vm0 = vcmask 261120   ;;  %v48_v0 = vld [vmem:[#allocation5 + $0x18] sm:$0xff]  ;;  %v47_v1 = vld [vmem:[#allocation5 + $0x10] sm:$0xff]  ;;  %s253_s24 = smov [#allocation7]  }
  0x1d   :  { %167 = vmatprep.subr.mxu0 %v48_v0  ;;  %v43_v2 = vld [vmem:[#allocation2] sm:$0xff]  ;;  %v46_v3 = vld [vmem:[#allocation5 + $0x8] sm:$0xff]  ;;  %v45_v4 = vld [vmem:[#allocation5] sm:$0xff]  ;;  %s145_s25 = sshll.u32 %s253_s24, 4  ;;  %s146_s25 = int_to_ptr.vmem [resolvable:$true] %s145_s25 }
  0x1e   :  { %168 = vmatpush3.msra.mxu0 %v48_v0  ;;  %175 = vmatprep.mubr.msk.f32.mxu0 %vm56_vm0, %v43_v2  ;;  %v44_v5 = vld [vmem:[#allocation2 + $0x8] sm:$0xff]  ;;  %v158_v6 = vld [vmem:[%s301_s2] ss:$0 sm:$0xff]  ;;  %s223_s26 = scalar_lea.vmem %s146_s25, 256  ;;  %p228_p11 = scmp.lt.s32.totalorder %s146_s25, %s146_s25 }
  0x1f   :  { %169 = vmatprep.subr.mxu0 %v47_v1  ;;  %p224_p10 = scmp.ne.s32.totalorder %s146_s25, %s223_s26  ;;  %p229_p12 = scmp.lt.s32.totalorder %s223_s26, %s223_s26 }
  0x20   :  { %170 = vmatpush3.msra.mxu0 %v47_v1 }
  0x21   :  { %171 = vmatprep.subr.mxu0 %v46_v3  ;;  %p230_p13 = por %p229_p12, %p228_p11 }
  0x22   :  { %172 = vmatpush3.msra.mxu0 %v46_v3 }
  0x23   :  { %173 = vmatprep.subr.mxu0 %v45_v4  ;;  %p231_p0 = pnand %p230_p13, %p224_p10 }
  0x24   :  { %174 = vmatpush3.msra.mxu0 %v45_v4 }
  0x25   :  { %176 = vmatmul.mubr.msk.f32.vlgmr.msra.gmra.mxu0 %vm56_vm0, %v44_v5 }
  0xe5   :  { %v177_v7 = vpop.f32.mrf.mxu0 }
  0xe6   :  { %v135_v8 = vadd.f32 %v177_v7, %v158_v6 }
  0xe7   :  { %v129_v9 = vpop.f32.mrf.mxu0 }
  0xe8   :  { %139 = vst.msk [vmem:[#allocation7 + $0x8] sm:$0xff] %vm56_vm0, %v135_v8  ;;  %v130_v10 = vadd.f32 %v158_v6, %v129_v9 }
  0xea   :  { %138 = vst.msk [vmem:[#allocation7] sm:$0xff] %vm56_vm0, %v130_v10 }
  0xeb   :  { %234 = shalt.err (!%p231_p0)
}
  0xec   :  { %151 = dma.vmem_to_hbm [thread:$0]  %s146_s25, 256, %s302_s3, [#allocation4], %s250_s15, %s250_s15, %s251_s16  }
  0xed   :  { %247 = dma.done.wait [#allocation4], 256  }
  0xee   :  { %248 = vsyncadd [#allocation4], 4294967040 }
  0xef   :  { %155 = vsyncpa [#allocation3], 1 }
  0xf0   :  { %156 = vsyncpa [#allocation6], 1 }
  0xf1   :  { %157 = vsyncpa [#allocation4], 1 }

</bundles_post_ra>
